<compile_context>
chip_gen: v5e
topology: v5e:2x2
jax: 0.10.0
libtpu: 0.0.40
codegen_flags: <defaults>
</compile_context>

<pallas_src>
import functools

import jax
import jax.numpy as jnp
from jax.experimental import pallas as pl
from jax.experimental.pallas import tpu as pltpu


def _round_up(x, m):
    return (x + m - 1) // m * m


def _focal_loss_kernel(logits_ref, target_ref, out_ref, *,
                       gamma, label_smoothing, n_valid, tile_n):
    pid = pl.program_id(0)

    xb = logits_ref[...]                     # (TILE_N, C) native dtype
    t = target_ref[...]                      # (TILE_N, 1) int32
    tn, c = xb.shape

    # Row max in native dtype (max is exact for bf16/f32); fuse the f32 upcast
    # into the subtraction so no standalone f32 copy of the tile is formed.
    m = jnp.max(xb, axis=-1, keepdims=True)                            # (TILE_N, 1)
    shifted = (xb - m).astype(jnp.float32)                             # (TILE_N, C)
    lse = jnp.log(jnp.sum(jnp.exp(shifted), axis=-1, keepdims=True))   # (TILE_N, 1)

    # Gather the (shifted) target logit via a one-hot mask (no dynamic gather).
    col = jax.lax.broadcasted_iota(jnp.int32, (tn, c), 1)
    sh_t = jnp.sum(jnp.where(col == t, shifted, 0.0), axis=-1, keepdims=True)
    logp_t = sh_t - lse                                                 # (TILE_N, 1)

    # PyTorch cross_entropy (reduction='none') with label smoothing:
    #   ce_i = -(1 - ls) * logp[i, t_i] - (ls / C) * sum_c logp[i, c]
    ce = -(1.0 - label_smoothing) * logp_t
    if label_smoothing != 0.0:  # static kwarg -> branch removed when ls == 0
        sum_logp = jnp.sum(shifted, axis=-1, keepdims=True) - c * lse
        ce = ce - (label_smoothing / c) * sum_logp
    # TODO(synk): per-class `weight` (default None in the module) is not implemented.

    pt = jnp.exp(-ce)
    om = 1.0 - pt
    g = float(gamma)
    if g == int(g) and int(g) >= 1:
        mod = om                              # gamma=2 -> one cheap VPU multiply
        for _ in range(int(g) - 1):
            mod = mod * om
    elif g == 0.0:
        mod = jnp.ones_like(om)
    else:
        mod = jnp.maximum(om, 0.0) ** g       # clamp avoids NaN from tiny negatives
    focal = mod * ce                                                    # (TILE_N, 1)

    # Mask rows past the true batch size in the (possibly ragged) last tile.
    # SELECT, not multiply, so NaN/Inf from unspecified tail data cannot leak.
    row = pid * tile_n + jax.lax.broadcasted_iota(jnp.int32, (tn, 1), 0)
    focal = jnp.where(row < n_valid, focal, 0.0)

    # Lane-dense per-tile partial sum; final mean over tiles is done in JAX.
    out_ref[...] = jnp.broadcast_to(jnp.sum(focal), (1, 128)).astype(jnp.float32)


def focal_loss(logits, target, *, gamma=2.0, label_smoothing=0.0, tile_n=4096):
    """logits: (N, C) float, target: (N,) int -> scalar float32 mean focal loss."""
    n, c = logits.shape
    itemsize = jnp.dtype(logits.dtype).itemsize

    # Dtype-aware tile sizing: 2x double-buffered native-dtype input block plus
    # ~3 live (tile_n, C) f32 intermediates, budgeted to ~24 MiB so it leaves
    # headroom even on v7x (64 MiB physical / 32 MiB scoped); v5e/v6e simply
    # get large, well-amortized tiles.
    budget_bytes = 24 * 1024 * 1024
    bytes_per_row = max(1, c * (2 * itemsize + 3 * 4))
    tile_cap = max(8, (budget_bytes // bytes_per_row) // 8 * 8)
    tile_n = max(8, min(int(tile_n), tile_cap, _round_up(n, 8)))

    # No wrapper-side pad (that would cost a full extra HBM pass over logits);
    # the ragged last tile is masked in-kernel.
    num_tiles = pl.cdiv(n, tile_n)

    # Need-based VMEM request with headroom, capped at 32 MiB.
    vmem_need = 2 * tile_n * c * itemsize + 4 * tile_n * c * 4 + (2 << 20)
    vmem_limit = int(min(max(vmem_need, 8 << 20), 32 << 20))

    target2d = target.astype(jnp.int32).reshape(n, 1)

    kernel = functools.partial(
        _focal_loss_kernel,
        gamma=float(gamma),
        label_smoothing=float(label_smoothing),
        n_valid=n,
        tile_n=tile_n,
    )

    partial = pl.pallas_call(
        kernel,
        out_shape=jax.ShapeDtypeStruct((num_tiles, 128), jnp.float32),
        grid_spec=pltpu.PrefetchScalarGridSpec(
            num_scalar_prefetch=0,
            grid=(num_tiles,),
            in_specs=[
                pl.BlockSpec((tile_n, c), lambda i: (i, 0)),
                pl.BlockSpec((tile_n, 1), lambda i: (i, 0)),
            ],
            out_specs=pl.BlockSpec((1, 128), lambda i: (i, 0)),
        ),
        compiler_params=pltpu.CompilerParams(
            dimension_semantics=("parallel",),   # independent tiles -> both v7x TCs
            vmem_limit_bytes=vmem_limit,
        ),
    )(logits, target2d)  # native-dtype DMA; f32 cast happens in-kernel

    return jnp.sum(partial[:, 0]) / n


def _ref_focal_loss(logits, target, gamma, label_smoothing):
    logits = logits.astype(jnp.float32)
    logp = jax.nn.log_softmax(logits, axis=-1)
    nll = -jnp.take_along_axis(logp, target[:, None], axis=-1)[:, 0]
    smooth = -jnp.mean(logp, axis=-1)
    ce = (1.0 - label_smoothing) * nll + label_smoothing * smooth
    pt = jnp.exp(-ce)
    return jnp.mean((1.0 - pt) ** gamma * ce)


if __name__ == "__main__":
    key = jax.random.PRNGKey(0)
    k1, k2, k3, k4 = jax.random.split(key, 4)

    # Test 1: module defaults (gamma=2.0, label_smoothing=0.0), single tile.
    N, C = 8, 32
    logits = jax.random.normal(k1, (N, C), dtype=jnp.float32)
    target = jax.random.randint(k2, (N,), 0, C, dtype=jnp.int32)
    loss = focal_loss(logits, target, gamma=2.0, label_smoothing=0.0)
    jax.block_until_ready(loss)
    ref = _ref_focal_loss(logits, target, 2.0, 0.0)
    assert jnp.allclose(loss, ref, rtol=1e-5, atol=1e-5), (loss, ref)

    # Test 2: multiple grid tiles + ragged (unpadded) last tile + label smoothing.
    N2, C2 = 20, 48
    logits2 = jax.random.normal(k3, (N2, C2), dtype=jnp.float32)
    target2 = jax.random.randint(k4, (N2,), 0, C2, dtype=jnp.int32)
    loss2 = focal_loss(logits2, target2, gamma=2.0, label_smoothing=0.1, tile_n=8)
    jax.block_until_ready(loss2)
    ref2 = _ref_focal_loss(logits2, target2, 2.0, 0.1)
    assert jnp.allclose(loss2, ref2, rtol=1e-5, atol=1e-5), (loss2, ref2)

    print("KERNEL_OK")
</pallas_src>

<mosaic_0001>
module attributes {stable_mosaic.version = 11 : i64} {
  func.func @_focal_loss_kernel(%arg0: i32, %arg1: memref<8x32xf32, #tpu.memory_space<vmem>>, %arg2: memref<8x1xi32, #tpu.memory_space<vmem>>, %arg3: memref<1x128xf32, #tpu.memory_space<vmem>>) attributes {dimension_semantics = [#tpu.dimension_semantics<parallel>], iteration_bounds = array<i64: 1>, scalar_prefetch = 0 : i64, scratch_operands = 0 : i64, tpu.core_type = #tpu.core_type<tc>, window_params = [{transform_indices = @transform_0, window_bounds = array<i64: 8, 32>}, {transform_indices = @transform_1, window_bounds = array<i64: 8, 1>}, {transform_indices = @transform_2, window_bounds = array<i64: 1, 128>}]} {
    %c0 = arith.constant 0 : index
    %c0_0 = arith.constant 0 : index
    %0 = vector.load %arg1[%c0, %c0_0] : memref<8x32xf32, #tpu.memory_space<vmem>>, vector<8x32xf32>
    %c0_1 = arith.constant 0 : index
    %c0_2 = arith.constant 0 : index
    %1 = vector.load %arg2[%c0_1, %c0_2] : memref<8x1xi32, #tpu.memory_space<vmem>>, vector<8x1xi32>
    %cst = arith.constant dense<0xFF800000> : vector<8xf32>
    %2 = vector.multi_reduction <maximumf>, %0, %cst [1] : vector<8x32xf32> to vector<8xf32>
    %3 = vector.shape_cast %2 : vector<8xf32> to vector<8x1xf32>
    %4 = vector.broadcast %3 : vector<8x1xf32> to vector<8x32xf32>
    %5 = arith.subf %0, %4 : vector<8x32xf32>
    %6 = math.exp %5 : vector<8x32xf32>
    %cst_3 = arith.constant dense<0.000000e+00> : vector<8xf32>
    %7 = vector.multi_reduction <add>, %6, %cst_3 [1] : vector<8x32xf32> to vector<8xf32>
    %8 = vector.shape_cast %7 : vector<8xf32> to vector<8x1xf32>
    %9 = math.log %8 : vector<8x1xf32>
    %10 = tpu.iota {dimensions = array<i32: 1>} : vector<8x32xi32>
    %11 = vector.broadcast %1 : vector<8x1xi32> to vector<8x32xi32>
    %12 = arith.cmpi eq, %10, %11 : vector<8x32xi32>
    %cst_4 = arith.constant 0.000000e+00 : f32
    %13 = vector.broadcast %cst_4 : f32 to vector<8x32xf32>
    %14 = arith.select %12, %5, %13 : vector<8x32xi1>, vector<8x32xf32>
    %cst_5 = arith.constant dense<0.000000e+00> : vector<8xf32>
    %15 = vector.multi_reduction <add>, %14, %cst_5 [1] : vector<8x32xf32> to vector<8xf32>
    %16 = vector.shape_cast %15 : vector<8xf32> to vector<8x1xf32>
    %17 = arith.subf %16, %9 : vector<8x1xf32>
    %cst_6 = arith.constant -1.000000e+00 : f32
    %18 = vector.broadcast %cst_6 : f32 to vector<8x1xf32>
    %19 = arith.mulf %18, %17 : vector<8x1xf32>
    %cst_7 = arith.constant 0.000000e+00 : f32
    %20 = vector.broadcast %cst_7 : f32 to vector<8x1xf32>
    %21 = arith.subf %20, %19 : vector<8x1xf32>
    %22 = math.exp %21 : vector<8x1xf32>
    %cst_8 = arith.constant 1.000000e+00 : f32
    %23 = vector.broadcast %cst_8 : f32 to vector<8x1xf32>
    %24 = arith.subf %23, %22 : vector<8x1xf32>
    %25 = arith.mulf %24, %24 : vector<8x1xf32>
    %26 = arith.mulf %25, %19 : vector<8x1xf32>
    %c8_i32 = arith.constant 8 : i32
    %27 = arith.muli %arg0, %c8_i32 : i32
    %28 = tpu.iota {dimensions = array<i32: 0>} : vector<8x1xi32>
    %29 = vector.broadcast %27 : i32 to vector<8x1xi32>
    %30 = arith.addi %29, %28 : vector<8x1xi32>
    %c8_i32_9 = arith.constant 8 : i32
    %31 = vector.broadcast %c8_i32_9 : i32 to vector<8x1xi32>
    %32 = arith.cmpi slt, %30, %31 : vector<8x1xi32>
    %cst_10 = arith.constant 0.000000e+00 : f32
    %33 = vector.broadcast %cst_10 : f32 to vector<8x1xf32>
    %34 = arith.select %32, %26, %33 : vector<8x1xi1>, vector<8x1xf32>
    %35 = vector.shape_cast %34 : vector<8x1xf32> to vector<1x8x1xf32>
    %cst_11 = arith.constant dense<0.000000e+00> : vector<1xf32>
    %36 = vector.multi_reduction <add>, %35, %cst_11 [1, 2] : vector<1x8x1xf32> to vector<1xf32>
    %37 = vector.shape_cast %36 : vector<1xf32> to vector<1x1x1xf32>
    %38 = vector.extract %37[0, 0, 0] : f32 from vector<1x1x1xf32>
    %39 = vector.broadcast %38 : f32 to vector<1x128xf32>
    %c0_12 = arith.constant 0 : index
    %c0_13 = arith.constant 0 : index
    %40 = vector.load %arg3[%c0_12, %c0_13] : memref<1x128xf32, #tpu.memory_space<vmem>>, vector<1x128xf32>
    tpu.vector_store %arg3[%c0_12, %c0_13], %39 {strides = array<i32>} : memref<1x128xf32, #tpu.memory_space<vmem>>, vector<1x128xf32>,
    return
  }
  func.func @transform_0(%arg0: i32) -> (i32, i32) {
    %c0_i32 = arith.constant 0 : i32
    %c0_i32_0 = arith.constant 0 : i32
    return %arg0, %c0_i32 : i32, i32
  }
  func.func @transform_1(%arg0: i32) -> (i32, i32) {
    %c0_i32 = arith.constant 0 : i32
    %c0_i32_0 = arith.constant 0 : i32
    return %arg0, %c0_i32 : i32, i32
  }
  func.func @transform_2(%arg0: i32) -> (i32, i32) {
    %c0_i32 = arith.constant 0 : i32
    %c0_i32_0 = arith.constant 0 : i32
    return %arg0, %c0_i32 : i32, i32
  }
}

</mosaic_0001>

<bundles_post_ra>
// kernel: tpu_custom_call.1
= control target key start
LH: loop header
LB: loop body
LE: loop exit
PB: predicated region body
PF: predicated region fallthrough
CT: control target
= control target key end

     0   :  { %vm14_vm0 = vcmask 261120   ;;  %s146_s0 = inlined_call_operand.vmem [shape: f32[8,32], index: 0, kind: input, shape index: {}]   ;;  %s147_s1 = inlined_call_operand.vmem [shape: s32[8,1], index: 1, kind: input, shape index: {}]   ;;  %s148_s2 = inlined_call_operand.hbm [shape: f32[1,128], index: 2, kind: output, shape index: {}]  }
   0x1   :  { %v12_v0 = vld [vmem:[%s146_s0] sm:$0xff] }
   0x2   :  { %7 = vsyncpa [#allocation3], 0  ;;  %v15_v1 = vsel %vm14_vm0, %v12_v0, -inf  ;;  %v117_v2 = vmov 0   ;;  %v13_v3 = vld [vmem:[%s147_s1] sm:$0xff]  ;;  %v26_v9 = vlaneseq  ;;  %vm51_vm2 = vcmask 7168  }
   0x3   :  { %84 = vset.pattern.permute.xlu0 %v117_v2  ;;  %s118_s0 = smov [#allocation2]   ;;  %s71_s15 = sshll.u32 %s148_s2, 4  ;;  %s72_s15 = int_to_ptr.hbm [resolvable:$true] %s71_s15 }
   0x4   :  { %16 = vmax.xlane.f32.xlu0 %v15_v1  ;;  %v27_v10 = vand.u32 127, %v26_v9  ;;  %s69_s1 = sshll.u32 %s118_s0, 4  ;;  %s70_s1 = int_to_ptr.vmem [resolvable:$true] %s69_s1 }
  0x18   :  { %29 = vperm.xlu0 %84, %v13_v3  }
  0x77   :  { %v17_v4 = vpop.xlane.xlu0 %16 }
  0x78   :  { %v18_v5 = vsub.f32 %v12_v0, %v17_v4 }
  0x7a   :  { %v19_v6 = vmul.f32 1.442695, %v18_v5 }
  0x7c   :  { %85 = vpow2.f32 %v19_v6 }
  0x82   :  { %v86_v7 = vpop.eup %85 }
  0x83   :  { %v21_v8 = vsel %vm14_vm0, %v86_v7, 0.0 }
  0x84   :  { %22 = vadd.xlane.f32.xlu1 %v21_v8 }
  0x8a   :  { %v30_v11 = vpop.permute.xlu0 %29 }
  0x8b   :  { %vm31_vm1 = vcmp.eq.s32.totalorder %v27_v10, %v30_v11 }
  0x8c   :  { %v32_v12 = vsel %vm31_vm1, %v18_v5, 0.0 }
  0x8d   :  { %v33_v13 = vsel %vm14_vm0, %v32_v12, 0.0 }
  0x8e   :  { %34 = vadd.xlane.f32.xlu1 %v33_v13 }
  0xf7   :  { %v23_v14 = vpop.xlane.xlu1 %22 }
  0xf8   :  { %87 = vlog2.f32 %v23_v14 }
  0xfe   :  { %v88_v15 = vpop.eup %87 }
  0xff   :  { %v25_v16 = vmul.f32 0.6931472, %v88_v15 }
 0x101   :  { %v35_v17 = vpop.xlane.xlu1 %34 }
 0x102   :  { %v36_v18 = vsub.f32 %v35_v17, %v25_v16 }
 0x104   :  { %v37_v19 = vmul.f32 -1.0, %v36_v18 }
 0x106   :  { %v38_v20 = vsub.f32 0.0, %v37_v19 }
 0x108   :  { %v39_v21 = vmul.f32 1.442695, %v38_v20 }
 0x10a   :  { %89 = vpow2.f32 %v39_v21 }
 0x110   :  { %v90_v22 = vpop.eup %89 }
 0x111   :  { %v41_v23 = vsub.f32 1.0, %v90_v22 }
 0x113   :  { %v42_v24 = vmul.f32 %v41_v23, %v41_v23 }
 0x115   :  { %v43_v25 = vmul.f32 %v42_v24, %v37_v19 }
 0x117   :  { %v52_v26 = vsel %vm51_vm2, %v43_v25, 0.0 }
 0x118   :  { %53 = vadd.xlane.f32.xlu2 %v52_v26 }
 0x18b   :  { %v54_v27 = vpop.xlane.xlu2 %53 }
 0x18c   :  { %v55_v28 = vrot.slane %v54_v27, 4 }
 0x18e   :  { %v56_v29 = vadd.f32 %v55_v28, %v54_v27 }
 0x190   :  { %v57_v30 = vrot.slane %v56_v29, 2 }
 0x192   :  { %v58_v31 = vadd.f32 %v57_v30, %v56_v29 }
 0x194   :  { %v59_v32 = vrot.slane %v58_v31, 1 }
 0x196   :  { %v60_v33 = vadd.f32 %v59_v32, %v58_v31 }
 0x198   :  { %80 = vpush %v60_v33 }
 0x1c9   :  { %s81_s16 = spop %80 }
 0x1ca   :  { %v62_v34 = vstv %s81_s16 }
 0x1cb   :  { %63 = vst [vmem:[#allocation2] sm:$0x1] %v62_v34 }
 0x1cc   :  { %74 = dma.vmem_to_hbm [thread:$0]  %s70_s1, 16, %s72_s15, [#allocation3]  }
 0x1cd   :  { %115 = dma.done.wait [#allocation3], 16  }
 0x1ce   :  { %116 = vsyncadd [#allocation3], 4294967280 }
 0x1cf   :  { %79 = vsyncpa [#allocation3], 1 }

</bundles_post_ra>
